<compile_context>
chip_gen: v7x
topology: tpu7x:2x2x1
jax: 0.10.0
libtpu: 0.0.40
codegen_flags: <defaults>
</compile_context>

<pallas_src>
import math

import numpy as np
import jax
import jax.numpy as jnp
from jax.experimental import pallas as pl
from jax.experimental.pallas import tpu as pltpu

_LANE = 128                              # vreg lane count (last-dim tile unit)
_SUBLANE = 8                             # vreg sublane count (2nd-to-last-dim tile unit)
_X_TILE_BYTES = 4 * 1024 * 1024          # per-buffer budget for the x tile
_VMEM_LIMIT_BYTES = 48 * 1024 * 1024     # < v7x's 64 MiB physical, > v5e/v6e scoped defaults


def build_positional_encoding(d_model: int, max_len: int = 5000,
                              dtype=jnp.float32) -> jnp.ndarray:
    """Same buffer as the PyTorch __init__; built directly in the model dtype so its
    DMA traffic matches x (halves pe bytes when the model runs bf16)."""
    pe = np.zeros((max_len, d_model), dtype=np.float32)
    position = np.arange(0, max_len, dtype=np.float32)[:, None]               # (max_len, 1)
    div_term = np.exp(np.arange(0, d_model, 2, dtype=np.float32)
                      * (-np.log(10000.0) / d_model))                          # (d_model//2,)
    pe[:, 0::2] = np.sin(position * div_term)
    pe[:, 1::2] = np.cos(position * div_term)
    return jnp.asarray(pe[None, :, :], dtype=dtype)                            # (1, max_len, d_model)


def _add_pe_kernel(x_ref, pe_ref, o_ref):
    # x tile: (bb, ts, W); pe tile: (1, ts, W) -> broadcast add over the batch dim.
    # Compute in x's dtype; cast pe defensively in case dtypes differ, and store with
    # an explicit astype (handles bf16 x / f32 pe correctly).
    x = x_ref[...]
    o_ref[...] = (x + pe_ref[...].astype(x.dtype)).astype(o_ref.dtype)


def positional_encoding_forward(x: jnp.ndarray, pe: jnp.ndarray) -> jnp.ndarray:
    """x: (B, S, D); pe: (1, max_len, D). Returns x + pe[:, :S, :]."""
    B, S, D = x.shape
    if pe.ndim != 3 or pe.shape[0] != 1 or pe.shape[2] != D:
        raise ValueError(f"pe must have shape (1, max_len, {D}); got {pe.shape}")
    max_len = pe.shape[1]
    if S > max_len:
        raise ValueError(f"sequence length {S} exceeds max_len {max_len}")

    # Lane-density widening: if D % 128 != 0, fold k rows into one row of width k*D
    # (contiguous reshape -> free) so output stores are unmasked full-lane writes.
    k = _LANE // math.gcd(D, _LANE)
    if k > 1 and S % k == 0 and max_len % k == 0 and (S // k) >= _SUBLANE:
        width = k * D
        xw = x.reshape(B, S // k, width)
        pew = pe.reshape(1, max_len // k, width)
    else:
        width = D
        xw = x
        pew = pe

    rows = xw.shape[1]
    pe_rows = pew.shape[1]
    itemsize = jnp.dtype(x.dtype).itemsize

    # How many (row, width) rows of x fit inside one pipeline buffer.
    budget_rows = max(_SUBLANE, _X_TILE_BYTES // (width * itemsize))

    if rows >= _SUBLANE:
        # Sequence tile: multiple of 8 (sublane), capped by the VMEM budget.
        ts = min(rows, budget_rows)
        ts = max(_SUBLANE, (ts // _SUBLANE) * _SUBLANE)
    else:
        # Tiny (< one sublane-tile of rows) problem: single full-extent tile. The pe
        # block must also span its full row extent to be layout-legal, so slice it
        # here; the extra copy is smaller than one tile and only hits this corner case.
        ts = rows
        if pe_rows != rows:
            pew = jax.lax.slice(pew, (0, 0, 0), (1, rows, width))

    # Fold as many batch elements into the block as the remaining budget allows.
    bb = max(1, min(B, budget_rows // ts))

    # Batch is the innermost (fastest) grid axis: pe's block index does not depend on
    # it, so each pe tile is DMA'd once per sequence tile and re-used across batch.
    grid = (pl.cdiv(rows, ts), pl.cdiv(B, bb))

    out = pl.pallas_call(
        _add_pe_kernel,
        out_shape=jax.ShapeDtypeStruct((B, rows, width), x.dtype),
        grid_spec=pltpu.PrefetchScalarGridSpec(
            num_scalar_prefetch=0,
            grid=grid,
            in_specs=[
                pl.BlockSpec((bb, ts, width), lambda s, b: (b, s, 0)),  # x tile
                pl.BlockSpec((1, ts, width), lambda s, b: (0, s, 0)),   # pe tile (shared over batch)
            ],
            out_specs=pl.BlockSpec((bb, ts, width), lambda s, b: (b, s, 0)),
        ),
        compiler_params=pltpu.CompilerParams(
            dimension_semantics=("parallel", "parallel"),
            vmem_limit_bytes=_VMEM_LIMIT_BYTES,
        ),
    )(xw, pew)

    return out.reshape(B, S, D)


if __name__ == "__main__":
    key = jax.random.PRNGKey(0)

    # Case 1: small shapes consistent with the module (no lane widening path).
    d_model, max_len, batch, seq = 32, 64, 2, 8
    pe = build_positional_encoding(d_model, max_len, dtype=jnp.float32)
    k1, k2 = jax.random.split(key)
    x = jax.random.normal(k1, (batch, seq, d_model), dtype=jnp.float32)
    out = jax.block_until_ready(positional_encoding_forward(x, pe))
    ref = x + pe[:, :seq, :]
    np.testing.assert_allclose(np.asarray(out), np.asarray(ref), rtol=1e-6, atol=1e-6)

    # Case 2: d_model not a multiple of 128 with a longer sequence (exercises the
    # lane-widening fold and batch folding into the block).
    d_model, max_len, batch, seq = 96, 512, 2, 256
    pe = build_positional_encoding(d_model, max_len, dtype=jnp.float32)
    x = jax.random.normal(k2, (batch, seq, d_model), dtype=jnp.float32)
    out = jax.block_until_ready(positional_encoding_forward(x, pe))
    ref = x + pe[:, :seq, :]
    np.testing.assert_allclose(np.asarray(out), np.asarray(ref), rtol=1e-6, atol=1e-6)

    print("KERNEL_OK")
</pallas_src>

<mosaic_0001>
module attributes {stable_mosaic.version = 11 : i64} {
  func.func @_add_pe_kernel(%arg0: i32, %arg1: i32, %arg2: memref<2x8x32xf32, #tpu.memory_space<vmem>>, %arg3: memref<1x8x32xf32, #tpu.memory_space<vmem>>, %arg4: memref<2x8x32xf32, #tpu.memory_space<vmem>>) attributes {dimension_semantics = [#tpu.dimension_semantics<parallel>, #tpu.dimension_semantics<parallel>], iteration_bounds = array<i64: 1, 1>, scalar_prefetch = 0 : i64, scratch_operands = 0 : i64, tpu.core_type = #tpu.core_type<tc>, window_params = [{transform_indices = @transform_0, window_bounds = array<i64: 2, 8, 32>}, {transform_indices = @transform_1, window_bounds = array<i64: 1, 8, 32>}, {transform_indices = @transform_2, window_bounds = array<i64: 2, 8, 32>}]} {
    %c0 = arith.constant 0 : index
    %c0_0 = arith.constant 0 : index
    %c0_1 = arith.constant 0 : index
    %0 = vector.load %arg2[%c0, %c0_0, %c0_1] : memref<2x8x32xf32, #tpu.memory_space<vmem>>, vector<2x8x32xf32>
    %c0_2 = arith.constant 0 : index
    %c0_3 = arith.constant 0 : index
    %c0_4 = arith.constant 0 : index
    %1 = vector.load %arg3[%c0_2, %c0_3, %c0_4] : memref<1x8x32xf32, #tpu.memory_space<vmem>>, vector<1x8x32xf32>
    %2 = vector.broadcast %1 : vector<1x8x32xf32> to vector<2x8x32xf32>
    %3 = arith.addf %0, %2 : vector<2x8x32xf32>
    %c0_5 = arith.constant 0 : index
    %c0_6 = arith.constant 0 : index
    %c0_7 = arith.constant 0 : index
    %4 = vector.load %arg4[%c0_5, %c0_6, %c0_7] : memref<2x8x32xf32, #tpu.memory_space<vmem>>, vector<2x8x32xf32>
    tpu.vector_store %arg4[%c0_5, %c0_6, %c0_7], %3 {strides = array<i32>} : memref<2x8x32xf32, #tpu.memory_space<vmem>>, vector<2x8x32xf32>,
    return
  }
  func.func @transform_0(%arg0: i32, %arg1: i32) -> (i32, i32, i32) {
    %c0_i32 = arith.constant 0 : i32
    %c0_i32_0 = arith.constant 0 : i32
    return %arg1, %arg0, %c0_i32 : i32, i32, i32
  }
  func.func @transform_1(%arg0: i32, %arg1: i32) -> (i32, i32, i32) {
    %c0_i32 = arith.constant 0 : i32
    %c0_i32_0 = arith.constant 0 : i32
    %c0_i32_1 = arith.constant 0 : i32
    return %c0_i32, %arg0, %c0_i32_0 : i32, i32, i32
  }
  func.func @transform_2(%arg0: i32, %arg1: i32) -> (i32, i32, i32) {
    %c0_i32 = arith.constant 0 : i32
    %c0_i32_0 = arith.constant 0 : i32
    return %arg1, %arg0, %c0_i32 : i32, i32, i32
  }
}

</mosaic_0001>

<bundles_post_ra>
// kernel: tpu_custom_call.1
= control target key start
LH: loop header
LB: loop body
LE: loop exit
PB: predicated region body
PF: predicated region fallthrough
CT: control target
= control target key end

     0   :  { %vm17_vm0 = vcmask 261120   ;;  %s102_s0 = inlined_call_operand.vmem [shape: f32[2,8,32], index: 0, kind: input, shape index: {}]   ;;  %s103_s1 = inlined_call_operand.vmem [shape: f32[1,64,32], index: 1, kind: input, shape index: {}]   ;;  %s104_s2 = inlined_call_operand.hbm [shape: f32[2,8,32], index: 2, kind: output, shape index: {}]  }
   0x1   :  { %v12_v0 = vld [vmem:[%s102_s0] sm:$0xff]  ;;  %v13_v2 = vld [vmem:[%s102_s0 + $0x8] sm:$0xff] }
   0x2   :  { %v14_v1 = vld [vmem:[%s103_s1] sm:$0xff] }
   0x3   :  { %v15_v3 = vadd.f32 %v14_v1, %v12_v0  ;;  %v16_v4 = vadd.f32 %v14_v1, %v13_v2 }
   0x4   :  { %7 = vsyncpa [#allocation3], 0  ;;  %s63_s15 = smov [#allocation2]  }
   0x5   :  { %s25_s16 = sshll.u32 %s63_s15, 4  ;;  %18 = vst.msk [vmem:[#allocation2] sm:$0xff] %vm17_vm0, %v15_v3  ;;  %19 = vst.msk [vmem:[#allocation2 + $0x8] sm:$0xff] %vm17_vm0, %v16_v4  ;;  %s26_s16 = int_to_ptr.vmem [resolvable:$true] %s25_s16 }
   0x6   :  { %s39_s17 = scalar_lea.vmem %s26_s16, 256  ;;  %p44_p1 = scmp.lt.s32.totalorder %s26_s16, %s26_s16 }
   0x7   :  { %p40_p0 = scmp.ne.s32.totalorder %s26_s16, %s39_s17  ;;  %p45_p2 = scmp.lt.s32.totalorder %s39_s17, %s39_s17 }
   0x9   :  { %p46_p3 = por %p45_p2, %p44_p1 }
   0xb   :  { %p47_p4 = pnand %p46_p3, %p40_p0 }
   0xd   :  { %50 = shalt.err (!%p47_p4)
}
   0xe   :  { %s51_s19 = scalar_lea.hbm %s104_s2, 256 }
   0xf   :  { %p52_p5 = scmp.ne.s32.totalorder %s104_s2, %s51_s19  ;;  %p55_p6 = scmp.lt.u32.totalorder %s51_s19, %s104_s2 }
  0x11   :  { %p57_p7 = pnand %p55_p6, %p52_p5 }
  0x13   :  { %60 = shalt.err (!%p57_p7)
}
  0x14   :  { %s64_s23 = smov 128   ;;  %s65_s24 = smov 8  }
  0x15   :  { %31 = dma.vmem_to_hbm [thread:$0]  %s26_s16, 256, %s104_s2, [#allocation3], %s64_s23, %s64_s23, %s65_s24  }
  0x16   :  { %61 = dma.done.wait [#allocation3], 256  }
  0x17   :  { %62 = vsyncadd [#allocation3], 4294967040 }
  0x18   :  { %35 = vsyncpa [#allocation3], 1 }

</bundles_post_ra>
